<compile_context>
chip_gen: v7x
topology: tpu7x:2x2x1
jax: 0.10.0
libtpu: 0.0.40
codegen_flags: <defaults>
</compile_context>

<pallas_src>
import functools

import jax
import jax.numpy as jnp
from jax.experimental import pallas as pl
from jax.experimental.pallas import tpu as pltpu

_LANE = 128


# ----------------------------- kernels ---------------------------------------

def _classifier_kernel_lane(x_ref, w_ref, b_ref, mask_ref, o_ref, *, n_rows):
    """Lane-dense variant.

    x_ref:    (TM, H)    activation row tile (f32 / bf16), pipelined
    w_ref:    (H, 1)     weight column, grid-resident
    b_ref:    (1,)       bias scalar in SMEM
    mask_ref: (1, 1, TM) lane-dense mask slab (f32)
    o_ref:    (1, 1, TM) lane-dense output slab (f32)
    """
    tm = x_ref.shape[0]
    # MXU contraction over H with f32 accumulation -> (TM, 1) column.
    h = jnp.dot(x_ref[...], w_ref[...], preferred_element_type=jnp.float32)
    h = h + b_ref[0]
    # Relayout the small (TM, 1) column into a lane-major (1, TM) row so the mask
    # read and output store are dense, unmasked DMAs.  ~TM/8 vregs of XLU work,
    # free in this DMA-bound kernel.
    h_row = h.reshape(1, tm)
    scores = jax.nn.sigmoid(h_row) * mask_ref[0]
    # Zero rows that fall past the end of the (possibly partial) last x block,
    # so clipped-DMA garbage (even NaN) never reaches the output.
    row = pl.program_id(0) * tm + jax.lax.broadcasted_iota(jnp.int32, (1, tm), 1)
    o_ref[0] = jnp.where(row < n_rows, scores, 0.0)


def _classifier_kernel_col(x_ref, w_ref, b_ref, mask_ref, o_ref, *, n_rows):
    """Column-layout fallback (same math, (TM, 1)-shaped mask/out blocks)."""
    tm = x_ref.shape[0]
    h = jnp.dot(x_ref[...], w_ref[...], preferred_element_type=jnp.float32)
    h = h + b_ref[...]                                   # (1, 1) bias tile
    scores = jax.nn.sigmoid(h) * mask_ref[...]
    row = pl.program_id(0) * tm + jax.lax.broadcasted_iota(jnp.int32, (tm, 1), 0)
    o_ref[...] = jnp.where(row < n_rows, scores, 0.0)


# ----------------------------- tiling helpers --------------------------------

def _round_up(x, m):
    return ((x + m - 1) // m) * m


def _vmem_capacity_bytes():
    try:
        cap = getattr(pltpu.get_tpu_info(), "vmem_capacity_bytes", None)
        if cap:
            return int(cap)
    except Exception:
        pass
    return 64 * 1024 * 1024        # conservative: v7x-sized per-TC VMEM


def _choose_block_rows(n_rows, hidden, itemsize, vmem_cap):
    """Row-tile size: as large as the per-generation VMEM budget allows
    (amortizes the ~0.35us/grid-step overhead; matters most on v7x at 3.2 TB/s),
    while (a) staying a multiple of the dtype's sublane pack and (b) leaving
    >= 2 grid steps when possible so v7x megacore gets both TensorCores."""
    sublane = 8 * max(1, 4 // itemsize)          # 8 rows f32, 16 rows bf16
    n_rows_pad = _round_up(max(n_rows, 1), sublane)
    # One x buffer <= ~cap/5 (double-buffered x + mask/out/weight headroom),
    # capped at 16 MiB (diminishing returns beyond that on every generation).
    per_buffer_budget = max(2 << 20, min(16 << 20, vmem_cap // 5))
    tm = per_buffer_budget // max(1, hidden * itemsize)
    if tm >= 512:
        tm = (tm // 512) * 512                   # keep output slabs lane-aligned
    tm = max(sublane, (tm // sublane) * sublane)
    tm = min(tm, n_rows_pad)
    if pl.cdiv(n_rows, tm) < 2 and n_rows_pad >= 2 * sublane:
        tm = _round_up(pl.cdiv(n_rows_pad, 2), sublane)   # >= 2 parallel steps
    return tm


def _vmem_limit_bytes(vmem_cap, tm, hidden, itemsize, lane_dense):
    x_bufs = 2 * tm * hidden * itemsize                      # double-buffered x
    if lane_dense:
        small = 2 * 2 * tm * 4 + 2 * hidden * itemsize       # dense mask/out + weight
    else:
        small = 2 * 2 * tm * _LANE * 4 + 2 * hidden * 4      # (tm,1) blocks lane-pad in VMEM
    need = x_bufs + small + (4 << 20)
    return int(min(vmem_cap * 3 // 4, max(32 << 20, need)))


def _cost_estimate(n, hidden, itemsize):
    return pl.CostEstimate(
        flops=2 * n * hidden,
        transcendentals=n,
        bytes_accessed=n * hidden * itemsize + 8 * n + hidden * itemsize)


# ----------------------------- forward paths ---------------------------------

def _forward_lane_dense(x, w, bias, mask_flat, tm, vmem_cap):
    n, hidden = x.shape
    itemsize = x.dtype.itemsize
    g = pl.cdiv(n, tm)
    n_slab = g * tm
    if n_slab != n:
        # Only the tiny mask (N * 4 bytes) is padded; the activations are NOT.
        mask_flat = jnp.pad(mask_flat, (0, n_slab - n))
    mask_slab = mask_flat.reshape(g, 1, tm)
    b_smem = bias.astype(jnp.float32).reshape(1)

    out = pl.pallas_call(
        functools.partial(_classifier_kernel_lane, n_rows=n),
        out_shape=jax.ShapeDtypeStruct((g, 1, tm), jnp.float32),
        grid_spec=pltpu.PrefetchScalarGridSpec(
            num_scalar_prefetch=0,
            grid=(g,),
            in_specs=[
                pl.BlockSpec((tm, hidden), lambda i: (i, 0)),        # x row tile (pipelined)
                pl.BlockSpec((hidden, 1), lambda i: (0, 0)),         # resident weight column
                pl.BlockSpec(memory_space=pltpu.MemorySpace.SMEM),   # bias scalar in SMEM
                pl.BlockSpec((1, 1, tm), lambda i: (i, 0, 0)),       # lane-dense mask slab
            ],
            out_specs=pl.BlockSpec((1, 1, tm), lambda i: (i, 0, 0)),  # lane-dense output slab
        ),
        compiler_params=pltpu.CompilerParams(
            dimension_semantics=("parallel",),
            vmem_limit_bytes=_vmem_limit_bytes(vmem_cap, tm, hidden, itemsize, True)),
        cost_estimate=_cost_estimate(n, hidden, itemsize),
    )(x, w, b_smem, mask_slab)
    return out.reshape(-1)[:n]


def _forward_column(x, w, bias, mask_flat, tm, vmem_cap):
    # Compatibility fallback: (TM, 1) mask/out blocks (proven layout).  Blocks are
    # lane-padded in VMEM, so keep the row tile modest.
    n, hidden = x.shape
    itemsize = x.dtype.itemsize
    tm = min(tm, 1024)
    g = pl.cdiv(n, tm)

    out = pl.pallas_call(
        functools.partial(_classifier_kernel_col, n_rows=n),
        out_shape=jax.ShapeDtypeStruct((n, 1), jnp.float32),
        grid_spec=pltpu.PrefetchScalarGridSpec(
            num_scalar_prefetch=0,
            grid=(g,),
            in_specs=[
                pl.BlockSpec((tm, hidden), lambda i: (i, 0)),
                pl.BlockSpec((hidden, 1), lambda i: (0, 0)),
                pl.BlockSpec((1, 1), lambda i: (0, 0)),
                pl.BlockSpec((tm, 1), lambda i: (i, 0)),
            ],
            out_specs=pl.BlockSpec((tm, 1), lambda i: (i, 0)),
        ),
        compiler_params=pltpu.CompilerParams(
            dimension_semantics=("parallel",),
            vmem_limit_bytes=_vmem_limit_bytes(vmem_cap, tm, hidden, itemsize, False)),
        cost_estimate=_cost_estimate(n, hidden, itemsize),
    )(x, w, bias.astype(jnp.float32).reshape(1, 1), mask_flat.reshape(n, 1))
    return out[:, 0]


_LANE_DENSE_OK = True   # flipped off if this Mosaic build rejects the in-kernel
                        # (TM,1)->(1,TM) relayout; the column fallback then runs.


def classifier_forward(inputs, mask_cls, weight, bias, block_rows=None):
    """BertSum Classifier forward.
    inputs: [B, S, H] (f32 or bf16), mask_cls: [B, S], weight: [1, H], bias: [1].
    Returns sent_scores: [B, S] f32."""
    global _LANE_DENSE_OK
    B, S, H = inputs.shape
    N = B * S

    x = inputs.reshape(N, H)                        # activations keep their dtype
    w = weight.reshape(H, 1).astype(inputs.dtype)   # bf16-native MXU; f32 accumulation
    mask_flat = mask_cls.astype(jnp.float32).reshape(N)   # module does mask_cls.float()

    vmem_cap = _vmem_capacity_bytes()
    itemsize = x.dtype.itemsize
    sublane = 8 * max(1, 4 // itemsize)
    if block_rows is not None:
        tm = max(sublane, _round_up(block_rows, sublane))
    else:
        tm = _choose_block_rows(N, H, itemsize, vmem_cap)

    if _LANE_DENSE_OK:
        try:
            return _forward_lane_dense(x, w, bias, mask_flat, tm, vmem_cap).reshape(B, S)
        except Exception:
            _LANE_DENSE_OK = False    # portability shim; fall through to column layout
    return _forward_column(x, w, bias, mask_flat, tm, vmem_cap).reshape(B, S)


# ----------------------------- self-test --------------------------------------

if __name__ == "__main__":
    key = jax.random.PRNGKey(0)
    k_x, k_m, k_w, k_b = jax.random.split(key, 4)

    # Small shapes consistent with the module: batch=2, sentences=8, hidden=32.
    B, S, H = 2, 8, 32
    inputs = jax.random.normal(k_x, (B, S, H), dtype=jnp.float32)
    mask_cls = (jax.random.uniform(k_m, (B, S)) > 0.25).astype(jnp.float32)

    bound = 1.0 / jnp.sqrt(H)
    weight = jax.random.uniform(k_w, (1, H), minval=-bound, maxval=bound, dtype=jnp.float32)
    bias = jax.random.uniform(k_b, (1,), minval=-bound, maxval=bound, dtype=jnp.float32)

    def reference(x, m, w, bvec):
        h = jnp.einsum("bsh,oh->bso",
                       x.astype(jnp.float32), w.astype(jnp.float32),
                       precision=jax.lax.Precision.HIGHEST)[..., 0]
        h = h + bvec.astype(jnp.float32)[0]
        return jax.nn.sigmoid(h) * m.astype(jnp.float32)

    out = jax.block_until_ready(classifier_forward(inputs, mask_cls, weight, bias))
    assert out.shape == (B, S)
    # MXU f32 matmul at default precision may use reduced-precision passes,
    # hence a modest tolerance vs the HIGHEST-precision reference.
    assert jnp.allclose(out, reference(inputs, mask_cls, weight, bias),
                        atol=2e-3, rtol=2e-3), "mismatch vs reference (f32)"

    # Second case: multi-step grid, partial (un-padded) final x block, bf16 inputs.
    B2, S2, H2 = 2, 13, 32
    k1, k2 = jax.random.split(k_x)
    inputs2 = jax.random.normal(k1, (B2, S2, H2), dtype=jnp.bfloat16)
    mask2 = (jax.random.uniform(k2, (B2, S2)) > 0.5).astype(jnp.float32)
    out2 = jax.block_until_ready(
        classifier_forward(inputs2, mask2, weight, bias, block_rows=16))
    assert out2.shape == (B2, S2)
    assert jnp.allclose(out2, reference(inputs2, mask2, weight, bias),
                        atol=2e-2, rtol=2e-2), "mismatch vs reference (bf16)"

    print("KERNEL_OK")
</pallas_src>

<mosaic_0001>
module attributes {stable_mosaic.version = 11 : i64} {
  func.func @_classifier_kernel_lane(%arg0: i32, %arg1: memref<8x32xf32, #tpu.memory_space<vmem>>, %arg2: memref<32x1xf32, #tpu.memory_space<vmem>>, %arg3: memref<1xf32, #tpu.memory_space<smem>>, %arg4: memref<1x1x8xf32, #tpu.memory_space<vmem>>, %arg5: memref<1x1x8xf32, #tpu.memory_space<vmem>>) attributes {dimension_semantics = [#tpu.dimension_semantics<parallel>], iteration_bounds = array<i64: 2>, scalar_prefetch = 0 : i64, scratch_operands = 0 : i64, tpu.core_type = #tpu.core_type<tc>, window_params = [{transform_indices = @transform_0, window_bounds = array<i64: 8, 32>}, {pipeline_mode = #tpu.pipeline_mode<synchronous>, transform_indices = @transform_1, window_bounds = array<i64: 32, 1>}, {transform_indices = @transform_2, window_bounds = array<i64: 1>}, {transform_indices = @transform_3, window_bounds = array<i64: 1, 1, 8>}, {transform_indices = @transform_4, window_bounds = array<i64: 1, 1, 8>}]} {
    %c0 = arith.constant 0 : index
    %c0_0 = arith.constant 0 : index
    %0 = vector.load %arg1[%c0, %c0_0] : memref<8x32xf32, #tpu.memory_space<vmem>>, vector<8x32xf32>
    %c0_1 = arith.constant 0 : index
    %c0_2 = arith.constant 0 : index
    %1 = vector.load %arg2[%c0_1, %c0_2] : memref<32x1xf32, #tpu.memory_space<vmem>>, vector<32x1xf32>
    %cst = arith.constant dense<0.000000e+00> : vector<8x1xf32>
    %2 = tpu.matmul %0, %1, %cst {dimension_numbers = #tpu.dot_dimension_numbers<[1], [0], [0], [1], [0, 0, 1, 1], [], []>} : vector<8x32xf32>, vector<32x1xf32>, vector<8x1xf32> -> vector<8x1xf32>
    %c0_3 = arith.constant 0 : index
    %3 = memref.load %arg3[%c0_3] : memref<1xf32, #tpu.memory_space<smem>>
    %4 = vector.broadcast %3 : f32 to vector<8x1xf32>
    %5 = arith.addf %2, %4 : vector<8x1xf32>
    %6 = vector.shape_cast %5 : vector<8x1xf32> to vector<1x8xf32>
    %7 = arith.negf %6 : vector<1x8xf32>
    %8 = math.exp %7 : vector<1x8xf32>
    %cst_4 = arith.constant 1.000000e+00 : f32
    %9 = vector.broadcast %cst_4 : f32 to vector<1x8xf32>
    %10 = arith.addf %9, %8 : vector<1x8xf32>
    %11 = arith.divf %9, %10 : vector<1x8xf32>
    %c0_5 = arith.constant 0 : index
    %c0_6 = arith.constant 0 : index
    %c0_7 = arith.constant 0 : index
    %12 = vector.load %arg4[%c0_5, %c0_6, %c0_7] : memref<1x1x8xf32, #tpu.memory_space<vmem>>, vector<1x1x8xf32>
    %13 = vector.shape_cast %12 : vector<1x1x8xf32> to vector<1x8xf32>
    %14 = arith.mulf %11, %13 : vector<1x8xf32>
    %c8_i32 = arith.constant 8 : i32
    %15 = arith.muli %arg0, %c8_i32 : i32
    %16 = tpu.iota {dimensions = array<i32: 1>} : vector<1x8xi32>
    %17 = vector.broadcast %15 : i32 to vector<1x8xi32>
    %18 = arith.addi %17, %16 : vector<1x8xi32>
    %c16_i32 = arith.constant 16 : i32
    %19 = vector.broadcast %c16_i32 : i32 to vector<1x8xi32>
    %20 = arith.cmpi slt, %18, %19 : vector<1x8xi32>
    %cst_8 = arith.constant 0.000000e+00 : f32
    %21 = vector.broadcast %cst_8 : f32 to vector<1x8xf32>
    %22 = arith.select %20, %14, %21 : vector<1x8xi1>, vector<1x8xf32>
    %c0_9 = arith.constant 0 : index
    %c0_10 = arith.constant 0 : index
    %c0_11 = arith.constant 0 : index
    %23 = vector.load %arg5[%c0_9, %c0_10, %c0_11] : memref<1x1x8xf32, #tpu.memory_space<vmem>>, vector<1x1x8xf32>
    %24 = vector.shape_cast %23 : vector<1x1x8xf32> to vector<1x8xf32>
    %25 = vector.shape_cast %22 : vector<1x8xf32> to vector<1x1x8xf32>
    tpu.vector_store %arg5[%c0_9, %c0_10, %c0_11], %25 {strides = array<i32>} : memref<1x1x8xf32, #tpu.memory_space<vmem>>, vector<1x1x8xf32>,
    return
  }
  func.func @transform_0(%arg0: i32) -> (i32, i32) {
    %c0_i32 = arith.constant 0 : i32
    %c0_i32_0 = arith.constant 0 : i32
    return %arg0, %c0_i32 : i32, i32
  }
  func.func @transform_1(%arg0: i32) -> (i32, i32) {
    %c0_i32 = arith.constant 0 : i32
    %c0_i32_0 = arith.constant 0 : i32
    %c0_i32_1 = arith.constant 0 : i32
    return %c0_i32, %c0_i32_0 : i32, i32
  }
  func.func @transform_2(%arg0: i32) -> i32 {
    %c0_i32 = arith.constant 0 : i32
    %c0_i32_0 = arith.constant 0 : i32
    return %c0_i32 : i32
  }
  func.func @transform_3(%arg0: i32) -> (i32, i32, i32) {
    %c0_i32 = arith.constant 0 : i32
    %c0_i32_0 = arith.constant 0 : i32
    %c0_i32_1 = arith.constant 0 : i32
    return %arg0, %c0_i32, %c0_i32_0 : i32, i32, i32
  }
  func.func @transform_4(%arg0: i32) -> (i32, i32, i32) {
    %c0_i32 = arith.constant 0 : i32
    %c0_i32_0 = arith.constant 0 : i32
    %c0_i32_1 = arith.constant 0 : i32
    return %arg0, %c0_i32, %c0_i32_0 : i32, i32, i32
  }
}

module attributes {stable_mosaic.version = 11 : i64} {
  func.func @_classifier_kernel_col(%arg0: i32, %arg1: memref<8x32xf32, #tpu.memory_space<vmem>>, %arg2: memref<32x1xf32, #tpu.memory_space<vmem>>, %arg3: memref<1x1xf32, #tpu.memory_space<vmem>>, %arg4: memref<8x1xf32, #tpu.memory_space<vmem>>, %arg5: memref<8x1xf32, #tpu.memory_space<vmem>>) attributes {dimension_semantics = [#tpu.dimension_semantics<parallel>], iteration_bounds = array<i64: 2>, scalar_prefetch = 0 : i64, scratch_operands = 0 : i64, tpu.core_type = #tpu.core_type<tc>, window_params = [{transform_indices = @transform_0, window_bounds = array<i64: 8, 32>}, {pipeline_mode = #tpu.pipeline_mode<synchronous>, transform_indices = @transform_1, window_bounds = array<i64: 32, 1>}, {pipeline_mode = #tpu.pipeline_mode<synchronous>, transform_indices = @transform_2, window_bounds = array<i64: 1, 1>}, {transform_indices = @transform_3, window_bounds = array<i64: 8, 1>}, {transform_indices = @transform_4, window_bounds = array<i64: 8, 1>}]} {
    %c0 = arith.constant 0 : index
    %c0_0 = arith.constant 0 : index
    %0 = vector.load %arg1[%c0, %c0_0] : memref<8x32xf32, #tpu.memory_space<vmem>>, vector<8x32xf32>
    %c0_1 = arith.constant 0 : index
    %c0_2 = arith.constant 0 : index
    %1 = vector.load %arg2[%c0_1, %c0_2] : memref<32x1xf32, #tpu.memory_space<vmem>>, vector<32x1xf32>
    %cst = arith.constant dense<0.000000e+00> : vector<8x1xf32>
    %2 = tpu.matmul %0, %1, %cst {dimension_numbers = #tpu.dot_dimension_numbers<[1], [0], [0], [1], [0, 0, 1, 1], [], []>} : vector<8x32xf32>, vector<32x1xf32>, vector<8x1xf32> -> vector<8x1xf32>
    %c0_3 = arith.constant 0 : index
    %c0_4 = arith.constant 0 : index
    %3 = vector.load %arg3[%c0_3, %c0_4] : memref<1x1xf32, #tpu.memory_space<vmem>>, vector<1x1xf32>
    %4 = vector.broadcast %3 : vector<1x1xf32> to vector<8x1xf32>
    %5 = arith.addf %2, %4 : vector<8x1xf32>
    %6 = arith.negf %5 : vector<8x1xf32>
    %7 = math.exp %6 : vector<8x1xf32>
    %cst_5 = arith.constant 1.000000e+00 : f32
    %8 = vector.broadcast %cst_5 : f32 to vector<8x1xf32>
    %9 = arith.addf %8, %7 : vector<8x1xf32>
    %10 = arith.divf %8, %9 : vector<8x1xf32>
    %c0_6 = arith.constant 0 : index
    %c0_7 = arith.constant 0 : index
    %11 = vector.load %arg4[%c0_6, %c0_7] : memref<8x1xf32, #tpu.memory_space<vmem>>, vector<8x1xf32>
    %12 = arith.mulf %10, %11 : vector<8x1xf32>
    %c8_i32 = arith.constant 8 : i32
    %13 = arith.muli %arg0, %c8_i32 : i32
    %14 = tpu.iota {dimensions = array<i32: 0>} : vector<8x1xi32>
    %15 = vector.broadcast %13 : i32 to vector<8x1xi32>
    %16 = arith.addi %15, %14 : vector<8x1xi32>
    %c16_i32 = arith.constant 16 : i32
    %17 = vector.broadcast %c16_i32 : i32 to vector<8x1xi32>
    %18 = arith.cmpi slt, %16, %17 : vector<8x1xi32>
    %cst_8 = arith.constant 0.000000e+00 : f32
    %19 = vector.broadcast %cst_8 : f32 to vector<8x1xf32>
    %20 = arith.select %18, %12, %19 : vector<8x1xi1>, vector<8x1xf32>
    %c0_9 = arith.constant 0 : index
    %c0_10 = arith.constant 0 : index
    %21 = vector.load %arg5[%c0_9, %c0_10] : memref<8x1xf32, #tpu.memory_space<vmem>>, vector<8x1xf32>
    tpu.vector_store %arg5[%c0_9, %c0_10], %20 {strides = array<i32>} : memref<8x1xf32, #tpu.memory_space<vmem>>, vector<8x1xf32>,
    return
  }
  func.func @transform_0(%arg0: i32) -> (i32, i32) {
    %c0_i32 = arith.constant 0 : i32
    %c0_i32_0 = arith.constant 0 : i32
    return %arg0, %c0_i32 : i32, i32
  }
  func.func @transform_1(%arg0: i32) -> (i32, i32) {
    %c0_i32 = arith.constant 0 : i32
    %c0_i32_0 = arith.constant 0 : i32
    %c0_i32_1 = arith.constant 0 : i32
    return %c0_i32, %c0_i32_0 : i32, i32
  }
  func.func @transform_2(%arg0: i32) -> (i32, i32) {
    %c0_i32 = arith.constant 0 : i32
    %c0_i32_0 = arith.constant 0 : i32
    %c0_i32_1 = arith.constant 0 : i32
    return %c0_i32, %c0_i32_0 : i32, i32
  }
  func.func @transform_3(%arg0: i32) -> (i32, i32) {
    %c0_i32 = arith.constant 0 : i32
    %c0_i32_0 = arith.constant 0 : i32
    return %arg0, %c0_i32 : i32, i32
  }
  func.func @transform_4(%arg0: i32) -> (i32, i32) {
    %c0_i32 = arith.constant 0 : i32
    %c0_i32_0 = arith.constant 0 : i32
    return %arg0, %c0_i32 : i32, i32
  }
}

</mosaic_0001>

<bundles_post_ra>
// kernel: tpu_custom_call.1
= control target key start
LH: loop header
LB: loop body
LE: loop exit
PB: predicated region body
PF: predicated region fallthrough
CT: control target
= control target key end

     0   :  { %s695_s0 = inlined_call_operand.vmem [shape: f32[16,32], index: 0, kind: input, shape index: {}]   ;;  %s696_s1 = inlined_call_operand.vmem [shape: f32[32,1], index: 1, kind: input, shape index: {}]   ;;  %s697_s2 = inlined_call_operand.<no memory space> [shape: f32[1], index: 2, kind: input, shape index: {}]   ;;  %s698_s3 = inlined_call_operand.vmem [shape: f32[2,1,8], index: 3, kind: input, shape index: {}]   ;;  %s699_s4 = inlined_call_operand.hbm [shape: f32[2,1,8], index: 4, kind: output, shape index: {}]  }
   0x1   :  { %9 = sst [smem:[#allocation2]] %s697_s2 }
   0x2   :  { %10 = vsyncpa [#allocation4], 0 }
   0x3   :  { %12 = vsyncpa [#allocation4 + $0x1], 0  ;;  %s579_s17 = smov 0   ;;  %s581_s18 = smov 0  }
   0x4   :  { %s583_s19 = smov 0   ;;  %s585_s20 = smov 0  }
   0x5 LB: > { %s600_s2 = sadd.s32 4294967295, %s544_s20   ;;  %s400_s21 = sadd.s32 4294967294, %s544_s20   ;;  %s544_s20 = sphi %s585_s20, %s705_s20   ;;  %s540_s19 = sphi %s583_s19, %s704_s19   ;;  %s536_s18 = sphi %s581_s18, %s703_s18   ;;  %s532_s17 = sphi %s579_s17, %s702_s17  }
   0x6   : > { %s604_s22 = sadd.s32 1, %s544_s20   ;;  %s119_s23 = sadd.s32 1, %s540_s19 }
   0x7   : > { %s116_s24 = ssub.s32 %s544_s20, %s604_s22  ;;  %p129_p0 = scmp.ne.s32.totalorder %s540_s19, %s536_s18 }
   0x8   : > { %p117_p1 = scmp.eq.s32.totalorder %s116_s24, 0  ;;  %p130_p2 = scmp.eq.s32.totalorder %s600_s2, 1 }
   0x9   : > { %p135_p3 = scmp.ne.s32.totalorder %s536_s18, %s532_s17  ;;  %p136_p4 = scmp.eq.s32.totalorder %s400_s21, 1 }
   0xa   : > { %s615_s25 = scalar_select %p117_p1, %s540_s19, %s119_s23  }
   0xb   : > { %p617_p5 = por %p130_p2, %p129_p0  ;;  %p621_p6 = por %p136_p4, %p135_p3 }
   0xc   : > { %p403_p7 = scmp.ge.s32.totalorder %s544_s20, 1  ;;  %p173_p8 = scmp.lt.s32.totalorder %s544_s20, 3 }
   0xe   : > { %p174_p9 = pnand %p403_p7, %p173_p8 }
   0xf   : > { %v208_v0 = vld [vmem:[%s696_s1] sm:$0xff] (!%p174_p9)  ;;  %v209_v1 = vld [vmem:[%s696_s1 + $0x8] sm:$0xff] (!%p174_p9)  ;;  %v210_v2 = vld [vmem:[%s696_s1 + $0x10] sm:$0xff] (!%p174_p9)  ;;  %v546_v3 = vmov (!%p174_p9), 0.0|0.0   ;;  %vm547_vm0 = vmmov (!%p174_p9), 0   ;;  %v548_v6 = vmov (!%p174_p9), 0.0   ;;  %v306_v21 = vlaneseq (!%p174_p9) }
  0x10   : > { %177 = sbr.rel (%p174_p9) target bundleno = 415 (0x19f), region = 36  ;;  %428 = vmatprep.subr.bf16.mxu0 (!%p174_p9), %v546_v3  ;;  %v429_v4 = vpack.c.bf16 (!%p174_p9), %v209_v1, %v208_v0  ;;  %v211_v5 = vld [vmem:[%s696_s1 + $0x18] sm:$0xff] (!%p174_p9)  ;;  %425 = vmatprep.mubr.msk.f32.mxu0 (!%p174_p9), %vm547_vm0, %v548_v6  ;;  %p200_p10 = scmp.lt.s32.totalorder (!%p174_p9), %s600_s2, 1  ;;  %vm214_vm1 = vcmask (!%p174_p9), 261120   ;;  %v549_v10 = vmov (!%p174_p9), 0   ;;  %vm321_vm3 = vcmask (!%p174_p9), 57344  }
  0x11   : > { %v432_v7 = vpack.c.bf16 (!%p174_p9), %v211_v5, %v210_v2  ;;  %477 = vset.pattern.permute.xlu0 (!%p174_p9), %v549_v10  ;;  %s212_s23 = sld [smem:[#allocation2]] (!%p174_p9)  ;;  %s408_s24 = sshll.u32 (!%p174_p9), %s600_s2, 3  ;;  %v307_v22 = vand.u32 (!%p174_p9), 127, %v306_v21  ;;  %v316_v24 = vshrl.u32 (!%p174_p9), %v306_v21, 7 }
  0x12   : > { %430 = vmatpush3.bf16.msra.mxu0 (!%p174_p9), %v429_v4  ;;  %v308_v23 = vstv (!%p174_p9), %s408_s24  ;;  %s198_s28 = sand.u32 (!%p174_p9), 1, %s536_s18   ;;  %s409_s29 = sshll.u32 (!%p174_p9), %s600_s2, 4 }
  0x13   : > { %431 = vmatprep.subr.bf16.mxu0 (!%p174_p9), %v546_v3  ;;  %v309_v25 = vadd.s32 (!%p174_p9), %v308_v23, %v307_v22  ;;  %v317_v26 = vsub.s32 (!%p174_p9), %v307_v22, %v316_v24  ;;  %s199_s30 = scalar_lea.vmem (!%p174_p9), [#allocation3], %s198_s28  ;;  %s653_s8 = scalar_lea.hbm (!%p174_p9), %s699_s4, %s409_s29 }
  0x14   : > { %s336_s5 = sshll.u32 (!%p174_p9), %s199_s30, 4  ;;  %s324_s9 = scalar_lea.sflag (!%p174_p9), [#allocation4], %s198_s28  ;;  %s655_s5 = int_to_ptr.vmem [resolvable:$true] %s336_s5 }
  0x15   : > { %vm310_vm2 = vcmp.lt.s32.totalorder (!%p174_p9), %v309_v25, 16 }
  0x16   : > { %433 = vmatpush3.bf16.msra.mxu0 (!%p174_p9), %v432_v7 }
  0x17   : > { %s201_s10 = scalar_select %p200_p10, %s600_s2, 1  ;;  %v213_v11 = vstv %s212_s23 }
  0x18   : > { %s482_s2 = scalar_lea.vmem %s655_s5, 16 }
  0x19   : > { %s404_s11 = sshll.u32 %s201_s10, 3  ;;  %s206_s14 = scalar_lea.vmem %s698_s3, %s201_s10 }
  0x1a   : > { %s203_s21 = scalar_lea.vmem %s695_s0, %s404_s11  ;;  %v407_v8 = vld [vmem:[%s206_s14] ss:$0 sm:$0xff]  ;;  %p483_p11 = scmp.ne.s32.totalorder %s655_s5, %s482_s2 }
  0x1b   : > { %v207_v9 = vld [vmem:[%s203_s21] sm:$0xff]  ;;  %301 = vbcast.lane.b32.xlu0 %v407_v8, 256  ;;  %s550_s10 = smov [#allocation3]  }
  0x1c   : > { %426 = vmatmul.mubr.msk.f32.vlgmr.msra.gmra.mrb[0].mxu0 %vm214_vm1, %v207_v9  ;;  %p484_p12 = pnand %p483_p11, %p617_p5  ;;  %s486_s11 = sshll.u32 %s550_s10, 4  ;;  %s487_s11 = int_to_ptr.vmem [resolvable:$false] %s486_s11 }
  0x1d   : > { %s488_s12 = scalar_lea.vmem %s487_s11, 32  ;;  %p489_p0 = scmp.lt.s32.totalorder %s655_s5, %s487_s11 }
  0x1e   : > { %p485_p13 = pneg %p484_p12  ;;  %p490_p1 = scmp.lt.s32.totalorder %s488_s12, %s482_s2 }
  0x20   : > { %p491_p2 = por %p490_p1, %p489_p0 }
  0x22   : > { %p492_p3 = pnand %p491_p2, %p485_p13 }
  0x8d   : > { %v302_v18 = vpop.permute.xlu0 %301 }
  0xef   : > { %v284_v12 = vpop.f32.mrb[0].mxu0 }
  0xf0   : > { %v285_v13 = vadd.f32 %v284_v12, %v213_v11  ;;  %v427_v14 = vpop.f32.mrb[1].mxu0 }
  0xf2   : > { %v406_v15 = vmul.f32 -1.442695, %v285_v13 }
  0xf4   : > { %478 = vpow2.f32 %v406_v15 }
  0xfe   : > { %v479_v16 = vpop.eup %478 }
  0xff   : > { %v291_v17 = vadd.f32 1.0, %v479_v16 }
 0x101   : > { %480 = vrcp.f32 %v291_v17 }
 0x10b   : > { %v481_v19 = vpop.eup %480 }
 0x10c   : > { %v304_v20 = vmul.f32 %v481_v19, %v302_v18 }
 0x10e   : > { %313 = vperm.xlu0 %477, %v304_v20  }
 0x18d   : > { %v314_v27 = vpop.permute.xlu0 %313 }
 0x18e   : > { %v318_v28 = vrot.slane %v314_v27, %v317_v26 }
 0x190   : > { %v320_v29 = vsel %vm310_vm2, %v318_v28, 0.0 }
 0x191   : > { %322 = vst.msk [vmem:[%s199_s30] sm:$0x1] %vm321_vm3, %v320_v29 }
 0x192   : > { %495 = shalt.err (!%p492_p3)
}
 0x193   : > { %s496_s13 = scalar_lea.hbm %s653_s8, 16  ;;  %s500_s16 = scalar_lea.hbm %s699_s4, 32 }
 0x194   : > { %p497_p4 = scmp.ne.s32.totalorder %s653_s8, %s496_s13  ;;  %p501_p9 = scmp.lt.u32.totalorder %s653_s8, %s699_s4 }
 0x195   : > { %p502_p10 = scmp.lt.u32.totalorder %s500_s16, %s496_s13  ;;  %p504_p12 = scmp.lt.u32.totalorder %s496_s13, %s653_s8 }
 0x196   : > { %p498_p7 = pnand %p497_p4, %p617_p5 }
 0x197   : > { %p503_p11 = por %p502_p10, %p501_p9 }
 0x198   : > { %p499_p8 = pneg %p498_p7 }
 0x199   : > { %p505_p13 = por %p504_p12, %p503_p11 }
 0x19b   : > { %p506_p0 = pnand %p505_p13, %p499_p8 }
 0x19d   : > { %509 = shalt.err (!%p506_p0)
}
 0x19e   : > { %434 = dma.vmem_to_hbm [thread:$0]  (%p617_p5), %s655_s5, 16, %s653_s8, %s324_s9  }
 0x19f PF: > { %p440_p1 = scmp.ge.s32.totalorder %s544_s20, 2  ;;  %s348_s24 = sand.u32 1, %s532_s17  }
 0x1a0   : > { %s349_s28 = scalar_lea.sflag [#allocation4], %s348_s24 }
 0x1a1   : > { %p437_p2 = pnand %p440_p1, %p621_p6 }
 0x1a3   : > { %527 = dma.done.wait (!%p437_p2), %s349_s28, 16  }
 0x1a4   : > { %529 = vsyncadd (!%p437_p2), %s349_s28, 4294967280  ;;  %p15_p3 = scmp.ge.s32.totalorder %s604_s22, 4   ;;  %s702_s17 = smov %s536_s18 }
 0x1a5   : > { %s703_s18 = smov %s540_s19  ;;  %s704_s19 = smov %s615_s25 }
 0x1a6   : > { %s705_s20 = smov %s604_s22  ;;  %17 = sbr.rel (!%p15_p3) target bundleno = 5 (0x5), region = 74 }
 0x1ad   :  { %353 = vsyncpa [#allocation4], 1 }
 0x1ae   :  { %355 = vsyncpa [#allocation4 + $0x1], 1 }

// kernel: tpu_custom_call.1
= control target key start
LH: loop header
LB: loop body
LE: loop exit
PB: predicated region body
PF: predicated region fallthrough
CT: control target
= control target key end

     0   :  { %s470_s17 = smov 0   ;;  %s507_s0 = inlined_call_operand.vmem [shape: f32[16,32], index: 0, kind: input, shape index: {}]   ;;  %s508_s1 = inlined_call_operand.vmem [shape: f32[32,1], index: 1, kind: input, shape index: {}]   ;;  %s509_s2 = inlined_call_operand.<no memory space> [shape: f32[1,1], index: 2, kind: input, shape index: {}]   ;;  %s510_s3 = inlined_call_operand.vmem [shape: f32[16,1], index: 3, kind: input, shape index: {}]   ;;  %s511_s4 = inlined_call_operand.vmem [shape: f32[16,1], index: 4, kind: output, shape index: {}]  }
   0x1   :  { %v9_v0 = vstv %s509_s2 }
   0x2   :  { %10 = vst [vmem:[#allocation2] sm:$0x1] %v9_v0 }
   0x3 LB: > { %s476_s18 = sadd.s32 4294967295, %s437_s17   ;;  %p384_p0 = scmp.ge.s32.totalorder %s437_s17, 1  ;;  %s437_s17 = sphi %s470_s17, %s16_s17  }
   0x4   : > { %p172_p1 = scmp.lt.s32.totalorder %s437_s17, 3 }
   0x6   : > { %p173_p2 = pnand %p384_p0, %p172_p1 }
   0x7   : > { %v213_v1 = vld [vmem:[%s508_s1] sm:$0xff] (!%p173_p2)  ;;  %v214_v2 = vld [vmem:[%s508_s1 + $0x8] sm:$0xff] (!%p173_p2)  ;;  %v215_v3 = vld [vmem:[%s508_s1 + $0x10] sm:$0xff] (!%p173_p2)  ;;  %v439_v4 = vmov (!%p173_p2), 0.0|0.0   ;;  %vm440_vm0 = vmmov (!%p173_p2), 0   ;;  %v441_v7 = vmov (!%p173_p2), 0.0   ;;  %v307_v17 = vlaneseq (!%p173_p2) }
   0x8   : > { %176 = sbr.rel (%p173_p2) target bundleno = 264 (0x108), region = 36  ;;  %410 = vmatprep.subr.bf16.mxu0 (!%p173_p2), %v439_v4  ;;  %v411_v5 = vpack.c.bf16 (!%p173_p2), %v214_v2, %v213_v1  ;;  %v216_v6 = vld [vmem:[%s508_s1 + $0x18] sm:$0xff] (!%p173_p2)  ;;  %407 = vmatprep.mubr.msk.f32.mxu0 (!%p173_p2), %vm440_vm0, %v441_v7  ;;  %p200_p3 = scmp.lt.s32.totalorder (!%p173_p2), %s476_s18, 1  ;;  %vm224_vm1 = vcmask (!%p173_p2), 261120   ;;  %vm313_vm3 = vcmask (!%p173_p2), 7168  }
   0x9   : > { %v414_v8 = vpack.c.bf16 (!%p173_p2), %v216_v6, %v215_v3  ;;  %v388_v10 = vld [vmem:[#allocation2] ss:$0 sm:$0xff] (!%p173_p2)  ;;  %s391_s5 = sshll.u32 (!%p173_p2), %s476_s18, 3  ;;  %v308_v18 = vshrl.u32 (!%p173_p2), %v307_v17, 7 }
   0xa   : > { %412 = vmatpush3.bf16.msra.mxu0 (!%p173_p2), %v411_v5  ;;  %v309_v19 = vstv (!%p173_p2), %s391_s5 }
   0xb   : > { %413 = vmatprep.subr.bf16.mxu0 (!%p173_p2), %v439_v4  ;;  %v310_v20 = vadd.s32 (!%p173_p2), %v309_v19, %v308_v18 }
   0xd   : > { %vm311_vm2 = vcmp.lt.s32.totalorder (!%p173_p2), %v310_v20, 16 }
   0xe   : > { %415 = vmatpush3.bf16.msra.mxu0 (!%p173_p2), %v414_v8 }
   0xf   : > { %s201_s26 = scalar_select %p200_p3, %s476_s18, 1 }
  0x11   : > { %s385_s27 = sshll.u32 %s201_s26, 3 }
  0x12   : > { %s203_s30 = scalar_lea.vmem %s507_s0, %s385_s27  ;;  %s207_s8 = scalar_lea.vmem %s510_s3, %s385_s27 }
  0x13   : > { %v212_v9 = vld [vmem:[%s203_s30] sm:$0xff]  ;;  %s211_s11 = scalar_lea.vmem %s511_s4, %s385_s27 }
  0x14   : > { %408 = vmatmul.mubr.msk.f32.vlgmr.msra.gmra.mrb[0].mxu0 %vm224_vm1, %v212_v9  ;;  %v304_v21 = vld [vmem:[%s207_s8] sm:$0xff] }
  0xe7   : > { %v294_v11 = vpop.f32.mrb[0].mxu0 }
  0xe8   : > { %v295_v12 = vadd.f32 %v388_v10, %v294_v11  ;;  %v409_v13 = vpop.f32.mrb[1].mxu0 }
  0xea   : > { %v390_v14 = vmul.f32 -1.442695, %v295_v12 }
  0xec   : > { %427 = vpow2.f32 %v390_v14 }
  0xf6   : > { %v428_v15 = vpop.eup %427 }
  0xf7   : > { %v301_v16 = vadd.f32 1.0, %v428_v15 }
  0xf9   : > { %429 = vrcp.f32 %v301_v16 }
 0x103   : > { %v430_v22 = vpop.eup %429 }
 0x104   : > { %v305_v23 = vmul.f32 %v430_v22, %v304_v21 }
 0x106   : > { %v312_v24 = vsel %vm311_vm2, %v305_v23, 0.0 }
 0x107   : > { %314 = vst.msk [vmem:[%s211_s11] sm:$0xff] %vm313_vm3, %v312_v24 }
 0x108 PF: > { %s16_s17 = sadd.s32 1, %s437_s17  }
 0x109   : > { %p13_p4 = scmp.ge.s32.totalorder %s16_s17, 4  }
 0x10b   :  { %15 = sbr.rel (!%p13_p4) target bundleno = 3 (0x3), region = 69 }

</bundles_post_ra>
